<compile_context>
chip_gen: v7x
topology: tpu7x:2x2x1
jax: 0.10.0
libtpu: 0.0.40
codegen_flags: <defaults>
</compile_context>

<pallas_src>
import functools

import jax
import jax.numpy as jnp
import numpy as np
from jax.experimental import pallas as pl
from jax.experimental.pallas import tpu as pltpu

# ----------------------------- config ----------------------------------------
ARGS = dict(
    input_dim=16,
    hidden_dim_1=64,
    hidden_dim_2=64,
    model_commonDim=32,
    bert_dim=768,
    leakySlope=0.1,
    dropout=0.0,          # eval-mode: dropout layers are identity
)


def _round_up(n, m):
    return -(-n // m) * m


# ----------------------------- kernel -----------------------------------------
def _decision_kernel(x_ref, txtT_ref,
                     w1_ref, b1_ref, w2_ref, b2_ref, w3_ref, b3_ref,
                     wt_ref, bt_ref,
                     out_ref, *, slope):
    def lrelu(y):
        return jnp.where(y >= 0, y, slope * y)

    # ---- InstanceEncoderMLP (f32; tiny, recomputed per text tile) ----
    h = lrelu(jnp.dot(x_ref[...], w1_ref[...],
                      preferred_element_type=jnp.float32) + b1_ref[...])
    h = lrelu(jnp.dot(h, w2_ref[...],
                      preferred_element_type=jnp.float32) + b2_ref[...])
    x_enc = lrelu(jnp.dot(h, w3_ref[...],
                          preferred_element_type=jnp.float32) + b3_ref[...])

    # ---- TextEncoder head, computed transposed: (C, TILE_T) ----
    # bf16 operands on the MXU, f32 accumulation; (C,1) column bias broadcasts
    # across full 128-lane vregs; LeakyReLU in f32.
    t_encT = lrelu(jnp.dot(wt_ref[...], txtT_ref[...],
                           preferred_element_type=jnp.float32) + bt_ref[...])

    # ---- result tile = x_enc (N_i, C) @ t_encT (C, TILE_T): lane-dense output ----
    out_ref[...] = jnp.dot(x_enc, t_encT,
                           preferred_element_type=jnp.float32).astype(out_ref.dtype)


# ----------------------------- wrapper -----------------------------------------
def prepare_params(params):
    """Hoist the per-call weight transposes / casts out of the forward path."""
    f32, bf16 = jnp.float32, jnp.bfloat16
    return dict(
        w1=params["w1"].T.astype(f32), b1=params["b1"].reshape(1, -1).astype(f32),
        w2=params["w2"].T.astype(f32), b2=params["b2"].reshape(1, -1).astype(f32),
        w3=params["w3"].T.astype(f32), b3=params["b3"].reshape(1, -1).astype(f32),
        wt=params["wt"].astype(bf16),                 # (C, bert_dim) PyTorch layout; no transpose needed
        bt=params["bt"].reshape(-1, 1).astype(f32),   # column bias for the transposed text head
    )


def decision_making_forward(x, text_pooled, kparams, *, leaky_slope, max_tile_t=512):
    N_i, D_in = x.shape
    N_t, bert_dim = text_pooled.shape
    C, _ = kparams["wt"].shape
    H1 = kparams["w1"].shape[1]
    H2 = kparams["w2"].shape[1]

    # Text tile = output-lane tile: multiple of 128, capped (VMEM-safe on all gens).
    TILE_T = min(max_tile_t, _round_up(N_t, 128))
    grid_t = pl.cdiv(N_t, TILE_T)
    Np_t = grid_t * TILE_T            # only the OUTPUT is padded (lane-dense store)

    x_f32 = x.astype(jnp.float32)
    txtT = text_pooled.astype(jnp.bfloat16).T        # (bert_dim, N_t), bf16 for the MXU

    c2 = lambda j: (0, 0)                            # pinned / resident blocks

    in_specs = [
        pl.BlockSpec((N_i, D_in), c2),                        # x (full array)
        pl.BlockSpec((bert_dim, TILE_T), lambda j: (0, j)),   # text tile (double-buffered)
        pl.BlockSpec((D_in, H1), c2),
        pl.BlockSpec((1, H1), c2),
        pl.BlockSpec((H1, H2), c2),
        pl.BlockSpec((1, H2), c2),
        pl.BlockSpec((H2, C), c2),
        pl.BlockSpec((1, C), c2),
        pl.BlockSpec((C, bert_dim), c2),
        pl.BlockSpec((C, 1), c2),
    ]

    out = pl.pallas_call(
        functools.partial(_decision_kernel, slope=leaky_slope),
        out_shape=jax.ShapeDtypeStruct((N_i, Np_t), jnp.float32),
        grid=(grid_t,),
        in_specs=in_specs,
        out_specs=pl.BlockSpec((N_i, TILE_T), lambda j: (0, j)),
        compiler_params=pltpu.CompilerParams(
            dimension_semantics=("parallel",)),      # v7x: split text tiles over 2 TCs
    )(x_f32, txtT,
      kparams["w1"], kparams["b1"], kparams["w2"], kparams["b2"],
      kparams["w3"], kparams["b3"], kparams["wt"], kparams["bt"])

    return out[:, :N_t]


# ----------------------------- reference (pure JAX, f32) ------------------------
def reference_forward(x, text_pooled, params, *, leaky_slope):
    lrelu = lambda y: jnp.where(y >= 0, y, leaky_slope * y)
    h = lrelu(x @ params["w1"].T + params["b1"])
    h = lrelu(h @ params["w2"].T + params["b2"])
    x_enc = lrelu(h @ params["w3"].T + params["b3"])
    t_enc = lrelu(text_pooled @ params["wt"].T + params["bt"])
    return x_enc @ t_enc.T


# ----------------------------- param init ---------------------------------------
def init_params(key, args):
    D = args["input_dim"]
    H1 = args["hidden_dim_1"]
    H2 = args["hidden_dim_2"]
    C = args["model_commonDim"]
    B = args["bert_dim"]

    keys = jax.random.split(key, 8)

    def linear(kw, kb, fan_in, fan_out):
        bound = 1.0 / np.sqrt(fan_in)
        w = jax.random.uniform(kw, (fan_out, fan_in), jnp.float32, -bound, bound)
        b = jax.random.uniform(kb, (fan_out,), jnp.float32, -bound, bound)
        return w, b

    p = {}
    p["w1"], p["b1"] = linear(keys[0], keys[1], D, H1)
    p["w2"], p["b2"] = linear(keys[2], keys[3], H1, H2)
    p["w3"], p["b3"] = linear(keys[4], keys[5], H2, C)
    p["wt"], p["bt"] = linear(keys[6], keys[7], B, C)
    return p


# ----------------------------- main ----------------------------------------------
if __name__ == "__main__":
    slope = ARGS["leakySlope"]

    key = jax.random.PRNGKey(0)
    k_x, k_t, k_p, k_x2, k_t2 = jax.random.split(key, 5)

    params = init_params(k_p, ARGS)
    kparams = prepare_params(params)

    # Small module-consistent case: 2 instances, 2 texts (BERT pooled stand-in).
    x = jax.random.normal(k_x, (2, ARGS["input_dim"]), jnp.float32)
    text_pooled = jax.random.normal(k_t, (2, ARGS["bert_dim"]), jnp.float32)

    out = decision_making_forward(x, text_pooled, kparams, leaky_slope=slope)
    out = jax.block_until_ready(out)
    ref = reference_forward(x, text_pooled, params, leaky_slope=slope)
    # bf16 MXU inputs for the K=768 text matmul -> widened tolerance vs f32 reference.
    np.testing.assert_allclose(np.asarray(out), np.asarray(ref), rtol=3e-2, atol=3e-2)

    # Larger case exercising the multi-tile text grid and a partial last tile.
    x2 = jax.random.normal(k_x2, (16, ARGS["input_dim"]), jnp.float32)
    text2 = jax.random.normal(k_t2, (700, ARGS["bert_dim"]), jnp.float32)
    out2 = jax.block_until_ready(
        decision_making_forward(x2, text2, kparams, leaky_slope=slope))
    ref2 = reference_forward(x2, text2, params, leaky_slope=slope)
    np.testing.assert_allclose(np.asarray(out2), np.asarray(ref2), rtol=3e-2, atol=3e-2)

    print("KERNEL_OK")
</pallas_src>

<mosaic_0001>
module attributes {stable_mosaic.version = 11 : i64} {
  func.func @_decision_kernel(%arg0: i32, %arg1: memref<2x16xf32, #tpu.memory_space<vmem>>, %arg2: memref<768x128xbf16, #tpu.memory_space<vmem>>, %arg3: memref<16x64xf32, #tpu.memory_space<vmem>>, %arg4: memref<1x64xf32, #tpu.memory_space<vmem>>, %arg5: memref<64x64xf32, #tpu.memory_space<vmem>>, %arg6: memref<1x64xf32, #tpu.memory_space<vmem>>, %arg7: memref<64x32xf32, #tpu.memory_space<vmem>>, %arg8: memref<1x32xf32, #tpu.memory_space<vmem>>, %arg9: memref<32x768xbf16, #tpu.memory_space<vmem>>, %arg10: memref<32x1xf32, #tpu.memory_space<vmem>>, %arg11: memref<2x128xf32, #tpu.memory_space<vmem>>) attributes {dimension_semantics = [#tpu.dimension_semantics<parallel>], iteration_bounds = array<i64: 1>, scalar_prefetch = 0 : i64, scratch_operands = 0 : i64, tpu.core_type = #tpu.core_type<tc>, window_params = [{pipeline_mode = #tpu.pipeline_mode<synchronous>, transform_indices = @transform_0, window_bounds = array<i64: 2, 16>}, {transform_indices = @transform_1, window_bounds = array<i64: 768, 128>}, {pipeline_mode = #tpu.pipeline_mode<synchronous>, transform_indices = @transform_2, window_bounds = array<i64: 16, 64>}, {pipeline_mode = #tpu.pipeline_mode<synchronous>, transform_indices = @transform_3, window_bounds = array<i64: 1, 64>}, {pipeline_mode = #tpu.pipeline_mode<synchronous>, transform_indices = @transform_4, window_bounds = array<i64: 64, 64>}, {pipeline_mode = #tpu.pipeline_mode<synchronous>, transform_indices = @transform_5, window_bounds = array<i64: 1, 64>}, {pipeline_mode = #tpu.pipeline_mode<synchronous>, transform_indices = @transform_6, window_bounds = array<i64: 64, 32>}, {pipeline_mode = #tpu.pipeline_mode<synchronous>, transform_indices = @transform_7, window_bounds = array<i64: 1, 32>}, {pipeline_mode = #tpu.pipeline_mode<synchronous>, transform_indices = @transform_8, window_bounds = array<i64: 32, 768>}, {pipeline_mode = #tpu.pipeline_mode<synchronous>, transform_indices = @transform_9, window_bounds = array<i64: 32, 1>}, {transform_indices = @transform_10, window_bounds = array<i64: 2, 128>}]} {
    %c0 = arith.constant 0 : index
    %c0_0 = arith.constant 0 : index
    %0 = vector.load %arg1[%c0, %c0_0] : memref<2x16xf32, #tpu.memory_space<vmem>>, vector<2x16xf32>
    %c0_1 = arith.constant 0 : index
    %c0_2 = arith.constant 0 : index
    %1 = vector.load %arg3[%c0_1, %c0_2] : memref<16x64xf32, #tpu.memory_space<vmem>>, vector<16x64xf32>
    %cst = arith.constant dense<0.000000e+00> : vector<2x64xf32>
    %2 = tpu.matmul %0, %1, %cst {dimension_numbers = #tpu.dot_dimension_numbers<[1], [0], [0], [1], [0, 0, 1, 1], [], []>} : vector<2x16xf32>, vector<16x64xf32>, vector<2x64xf32> -> vector<2x64xf32>
    %c0_3 = arith.constant 0 : index
    %c0_4 = arith.constant 0 : index
    %3 = vector.load %arg4[%c0_3, %c0_4] : memref<1x64xf32, #tpu.memory_space<vmem>>, vector<1x64xf32>
    %4 = vector.broadcast %3 : vector<1x64xf32> to vector<2x64xf32>
    %5 = arith.addf %2, %4 : vector<2x64xf32>
    %cst_5 = arith.constant 0.000000e+00 : f32
    %6 = vector.broadcast %cst_5 : f32 to vector<2x64xf32>
    %7 = arith.cmpf oge, %5, %6 : vector<2x64xf32>
    %cst_6 = arith.constant 1.000000e-01 : f32
    %8 = vector.broadcast %cst_6 : f32 to vector<2x64xf32>
    %9 = arith.mulf %8, %5 : vector<2x64xf32>
    %10 = arith.select %7, %5, %9 : vector<2x64xi1>, vector<2x64xf32>
    %c0_7 = arith.constant 0 : index
    %c0_8 = arith.constant 0 : index
    %11 = vector.load %arg5[%c0_7, %c0_8] : memref<64x64xf32, #tpu.memory_space<vmem>>, vector<64x64xf32>
    %cst_9 = arith.constant dense<0.000000e+00> : vector<2x64xf32>
    %12 = tpu.matmul %10, %11, %cst_9 {dimension_numbers = #tpu.dot_dimension_numbers<[1], [0], [0], [1], [0, 0, 1, 1], [], []>} : vector<2x64xf32>, vector<64x64xf32>, vector<2x64xf32> -> vector<2x64xf32>
    %c0_10 = arith.constant 0 : index
    %c0_11 = arith.constant 0 : index
    %13 = vector.load %arg6[%c0_10, %c0_11] : memref<1x64xf32, #tpu.memory_space<vmem>>, vector<1x64xf32>
    %14 = vector.broadcast %13 : vector<1x64xf32> to vector<2x64xf32>
    %15 = arith.addf %12, %14 : vector<2x64xf32>
    %cst_12 = arith.constant 0.000000e+00 : f32
    %16 = vector.broadcast %cst_12 : f32 to vector<2x64xf32>
    %17 = arith.cmpf oge, %15, %16 : vector<2x64xf32>
    %cst_13 = arith.constant 1.000000e-01 : f32
    %18 = vector.broadcast %cst_13 : f32 to vector<2x64xf32>
    %19 = arith.mulf %18, %15 : vector<2x64xf32>
    %20 = arith.select %17, %15, %19 : vector<2x64xi1>, vector<2x64xf32>
    %c0_14 = arith.constant 0 : index
    %c0_15 = arith.constant 0 : index
    %21 = vector.load %arg7[%c0_14, %c0_15] : memref<64x32xf32, #tpu.memory_space<vmem>>, vector<64x32xf32>
    %cst_16 = arith.constant dense<0.000000e+00> : vector<2x32xf32>
    %22 = tpu.matmul %20, %21, %cst_16 {dimension_numbers = #tpu.dot_dimension_numbers<[1], [0], [0], [1], [0, 0, 1, 1], [], []>} : vector<2x64xf32>, vector<64x32xf32>, vector<2x32xf32> -> vector<2x32xf32>
    %c0_17 = arith.constant 0 : index
    %c0_18 = arith.constant 0 : index
    %23 = vector.load %arg8[%c0_17, %c0_18] : memref<1x32xf32, #tpu.memory_space<vmem>>, vector<1x32xf32>
    %24 = vector.broadcast %23 : vector<1x32xf32> to vector<2x32xf32>
    %25 = arith.addf %22, %24 : vector<2x32xf32>
    %cst_19 = arith.constant 0.000000e+00 : f32
    %26 = vector.broadcast %cst_19 : f32 to vector<2x32xf32>
    %27 = arith.cmpf oge, %25, %26 : vector<2x32xf32>
    %cst_20 = arith.constant 1.000000e-01 : f32
    %28 = vector.broadcast %cst_20 : f32 to vector<2x32xf32>
    %29 = arith.mulf %28, %25 : vector<2x32xf32>
    %30 = arith.select %27, %25, %29 : vector<2x32xi1>, vector<2x32xf32>
    %c0_21 = arith.constant 0 : index
    %c0_22 = arith.constant 0 : index
    %31 = vector.load %arg9[%c0_21, %c0_22] : memref<32x768xbf16, #tpu.memory_space<vmem>>, vector<32x768xbf16>
    %c0_23 = arith.constant 0 : index
    %c0_24 = arith.constant 0 : index
    %32 = vector.load %arg2[%c0_23, %c0_24] : memref<768x128xbf16, #tpu.memory_space<vmem>>, vector<768x128xbf16>
    %cst_25 = arith.constant dense<0.000000e+00> : vector<32x128xf32>
    %33 = tpu.matmul %31, %32, %cst_25 {dimension_numbers = #tpu.dot_dimension_numbers<[1], [0], [0], [1], [0, 0, 1, 1], [], []>} : vector<32x768xbf16>, vector<768x128xbf16>, vector<32x128xf32> -> vector<32x128xf32>
    %c0_26 = arith.constant 0 : index
    %c0_27 = arith.constant 0 : index
    %34 = vector.load %arg10[%c0_26, %c0_27] : memref<32x1xf32, #tpu.memory_space<vmem>>, vector<32x1xf32>
    %35 = vector.broadcast %34 : vector<32x1xf32> to vector<32x128xf32>
    %36 = arith.addf %33, %35 : vector<32x128xf32>
    %cst_28 = arith.constant 0.000000e+00 : f32
    %37 = vector.broadcast %cst_28 : f32 to vector<32x128xf32>
    %38 = arith.cmpf oge, %36, %37 : vector<32x128xf32>
    %cst_29 = arith.constant 1.000000e-01 : f32
    %39 = vector.broadcast %cst_29 : f32 to vector<32x128xf32>
    %40 = arith.mulf %39, %36 : vector<32x128xf32>
    %41 = arith.select %38, %36, %40 : vector<32x128xi1>, vector<32x128xf32>
    %cst_30 = arith.constant dense<0.000000e+00> : vector<2x128xf32>
    %42 = tpu.matmul %30, %41, %cst_30 {dimension_numbers = #tpu.dot_dimension_numbers<[1], [0], [0], [1], [0, 0, 1, 1], [], []>} : vector<2x32xf32>, vector<32x128xf32>, vector<2x128xf32> -> vector<2x128xf32>
    %c0_31 = arith.constant 0 : index
    %c0_32 = arith.constant 0 : index
    %43 = vector.load %arg11[%c0_31, %c0_32] : memref<2x128xf32, #tpu.memory_space<vmem>>, vector<2x128xf32>
    tpu.vector_store %arg11[%c0_31, %c0_32], %42 {strides = array<i32>} : memref<2x128xf32, #tpu.memory_space<vmem>>, vector<2x128xf32>,
    return
  }
  func.func @transform_0(%arg0: i32) -> (i32, i32) {
    %c0_i32 = arith.constant 0 : i32
    %c0_i32_0 = arith.constant 0 : i32
    %c0_i32_1 = arith.constant 0 : i32
    return %c0_i32, %c0_i32_0 : i32, i32
  }
  func.func @transform_1(%arg0: i32) -> (i32, i32) {
    %c0_i32 = arith.constant 0 : i32
    %c0_i32_0 = arith.constant 0 : i32
    return %c0_i32, %arg0 : i32, i32
  }
  func.func @transform_2(%arg0: i32) -> (i32, i32) {
    %c0_i32 = arith.constant 0 : i32
    %c0_i32_0 = arith.constant 0 : i32
    %c0_i32_1 = arith.constant 0 : i32
    return %c0_i32, %c0_i32_0 : i32, i32
  }
  func.func @transform_3(%arg0: i32) -> (i32, i32) {
    %c0_i32 = arith.constant 0 : i32
    %c0_i32_0 = arith.constant 0 : i32
    %c0_i32_1 = arith.constant 0 : i32
    return %c0_i32, %c0_i32_0 : i32, i32
  }
  func.func @transform_4(%arg0: i32) -> (i32, i32) {
    %c0_i32 = arith.constant 0 : i32
    %c0_i32_0 = arith.constant 0 : i32
    %c0_i32_1 = arith.constant 0 : i32
    return %c0_i32, %c0_i32_0 : i32, i32
  }
  func.func @transform_5(%arg0: i32) -> (i32, i32) {
    %c0_i32 = arith.constant 0 : i32
    %c0_i32_0 = arith.constant 0 : i32
    %c0_i32_1 = arith.constant 0 : i32
    return %c0_i32, %c0_i32_0 : i32, i32
  }
  func.func @transform_6(%arg0: i32) -> (i32, i32) {
    %c0_i32 = arith.constant 0 : i32
    %c0_i32_0 = arith.constant 0 : i32
    %c0_i32_1 = arith.constant 0 : i32
    return %c0_i32, %c0_i32_0 : i32, i32
  }
  func.func @transform_7(%arg0: i32) -> (i32, i32) {
    %c0_i32 = arith.constant 0 : i32
    %c0_i32_0 = arith.constant 0 : i32
    %c0_i32_1 = arith.constant 0 : i32
    return %c0_i32, %c0_i32_0 : i32, i32
  }
  func.func @transform_8(%arg0: i32) -> (i32, i32) {
    %c0_i32 = arith.constant 0 : i32
    %c0_i32_0 = arith.constant 0 : i32
    %c0_i32_1 = arith.constant 0 : i32
    return %c0_i32, %c0_i32_0 : i32, i32
  }
  func.func @transform_9(%arg0: i32) -> (i32, i32) {
    %c0_i32 = arith.constant 0 : i32
    %c0_i32_0 = arith.constant 0 : i32
    %c0_i32_1 = arith.constant 0 : i32
    return %c0_i32, %c0_i32_0 : i32, i32
  }
  func.func @transform_10(%arg0: i32) -> (i32, i32) {
    %c0_i32 = arith.constant 0 : i32
    %c0_i32_0 = arith.constant 0 : i32
    return %c0_i32, %arg0 : i32, i32
  }
}

</mosaic_0001>

<bundles_post_ra>
// kernel: tpu_custom_call.1
= control target key start
LH: loop header
LB: loop body
LE: loop exit
PB: predicated region body
PF: predicated region fallthrough
CT: control target
= control target key end

     0   :  { %v1398_v2 = vmov 0.0|0.0   ;;  %vm1399_vm0 = vmmov 0   ;;  %v1400_v4 = vmov 0.0   ;;  %vm47_vm1 = vcmask 130048   ;;  %s1749_s0 = inlined_call_operand.vmem [shape: f32[2,16], index: 0, kind: input, shape index: {}]   ;;  %s1750_s1 = inlined_call_operand.vmem [shape: bf16[768,2], index: 1, kind: input, shape index: {}]   ;;  %s1751_s2 = inlined_call_operand.vmem [shape: f32[16,64], index: 2, kind: input, shape index: {}]   ;;  %s1752_s3 = inlined_call_operand.vmem [shape: f32[1,64], index: 3, kind: input, shape index: {}]   ;;  %s1753_s4 = inlined_call_operand.vmem [shape: f32[64,64], index: 4, kind: input, shape index: {}]   ;;  %s1754_s5 = inlined_call_operand.vmem [shape: f32[1,64], index: 5, kind: input, shape index: {}]   ;;  %s1755_s6 = inlined_call_operand.vmem [shape: f32[64,32], index: 6, kind: input, shape index: {}]   ;;  %s1756_s7 = inlined_call_operand.vmem [shape: f32[1,32], index: 7, kind: input, shape index: {}]   ;;  %s1757_s8 = inlined_call_operand.vmem [shape: bf16[32,768], index: 8, kind: input, shape index: {}]   ;;  %s1758_s9 = inlined_call_operand.vmem [shape: f32[32,1], index: 9, kind: input, shape index: {}]   ;;  %s1759_s10 = inlined_call_operand.hbm [shape: f32[2,128], index: 10, kind: output, shape index: {}]  }
   0x1   :  { %v38_v0 = vld [vmem:[%s1751_s2] sm:$0xff]  ;;  %v39_v1 = vld [vmem:[%s1751_s2 + $0x8] sm:$0xff]  ;;  %1268 = vmatprep.subr.bf16.mxu1 %v1398_v2  ;;  %1216 = vmatprep.mubr.msk.f32.mxu1 %vm1399_vm0, %v1400_v4  ;;  %v126_v9 = vld [vmem:[%s1753_s4 + $0x10] sm:$0xff] }
   0x2   :  { %v1269_v3 = vpack.c.bf16 %v39_v1, %v38_v0  ;;  %v124_v5 = vld [vmem:[%s1753_s4] sm:$0xff]  ;;  %v125_v6 = vld [vmem:[%s1753_s4 + $0x8] sm:$0xff]  ;;  %1271 = vmatprep.subr.bf16.mxu0 %v1398_v2  ;;  %v127_v10 = vld [vmem:[%s1753_s4 + $0x18] sm:$0xff]  ;;  %1235 = vmatprep.mubr.msk.f32.mxu0 %vm1399_vm0, %v1400_v4 }
   0x3   :  { %v37_v7 = vld [vmem:[%s1749_s0] sm:$0x3]  ;;  %v1272_v8 = vpack.c.bf16 %v125_v6, %v124_v5  ;;  %v129_v12 = vld [vmem:[%s1753_s4 + $0x28] sm:$0xff]  ;;  %v1275_v13 = vpack.c.bf16 %v127_v10, %v126_v9 }
   0x4   :  { %1270 = vmatpush3.bf16.msra.mxu1 %v1269_v3  ;;  %v128_v11 = vld [vmem:[%s1753_s4 + $0x20] sm:$0xff] }
   0x5   :  { %1273 = vmatpush3.bf16.msra.mxu0 %v1272_v8  ;;  %v1278_v14 = vpack.c.bf16 %v129_v12, %v128_v11 }
   0x6   :  { %1274 = vmatprep.subr.bf16.mxu0 %v1398_v2 }
   0x7   :  { %1217 = vmatmul.mubr.msk.f32.vlgmr.msra.gmra.mrb[0].mxu1 %vm47_vm1, %v37_v7 }
   0x9   :  { %1276 = vmatpush3.bf16.msra.mxu0 %v1275_v13 }
   0xa   :  { %1277 = vmatprep.subr.bf16.mxu0 %v1398_v2 }
   0xd   :  { %1279 = vmatpush3.bf16.msra.mxu0 %v1278_v14 }
   0xe   :  { %1280 = vmatprep.subr.bf16.mxu0 %v1398_v2 }
   0xf   :  { %15 = vsyncpa [#allocation3], 0  ;;  %v130_v15 = vld [vmem:[%s1753_s4 + $0x30] sm:$0xff]  ;;  %v131_v16 = vld [vmem:[%s1753_s4 + $0x38] sm:$0xff]  ;;  %vm139_vm3 = vcmask 523264   ;;  %vm946_vm10 = vcmask 261120  }
  0x10   :  { %v1281_v17 = vpack.c.bf16 %v131_v16, %v130_v15  ;;  %v1308_v18 = vld [vmem:[%s1750_s1 + $0x40] sm:$0xff]   ;;  %v1310_v20 = vld [vmem:[%s1750_s1 + $0x48] sm:$0xff]   ;;  %v1312_v22 = vld [vmem:[%s1750_s1 + $0x50] sm:$0xff]  }
  0x11   :  { %v1309_v19 = vld [vmem:[%s1750_s1] sm:$0xff]   ;;  %1123 = vmatprep.subr.bf16.mxu1 %v1308_v18  ;;  %v1311_v21 = vld [vmem:[%s1750_s1 + $0x8] sm:$0xff]   ;;  %v1313_v23 = vld [vmem:[%s1750_s1 + $0x10] sm:$0xff]  }
  0x12   :  { %1282 = vmatpush3.bf16.msra.mxu0 %v1281_v17  ;;  %1124 = vmatpush3.bf16.msra.mxu1 %v1309_v19  ;;  %v1314_v24 = vld [vmem:[%s1750_s1 + $0x58] sm:$0xff]   ;;  %v1316_v26 = vld [vmem:[%s1750_s1 + $0x60] sm:$0xff]   ;;  %v1318_v28 = vld [vmem:[%s1750_s1 + $0x68] sm:$0xff]   ;;  %v1401_v17 = vmov 0  }
  0x13   :  { %1283 = vmatprep.subr.bf16.mxu0 %v1398_v2  ;;  %1125 = vmatprep.subr.bf16.mxu1 %v1310_v20  ;;  %v1315_v25 = vld [vmem:[%s1750_s1 + $0x18] sm:$0xff]   ;;  %v1317_v27 = vld [vmem:[%s1750_s1 + $0x20] sm:$0xff]   ;;  %v1319_v29 = vld [vmem:[%s1750_s1 + $0x28] sm:$0xff]  }
  0x14   :  { %v1320_v30 = vld [vmem:[%s1750_s1 + $0x70] sm:$0xff]   ;;  %v1035_v32 = vld [vmem:[%s1752_s3] ss:$0 sm:$0xff]  ;;  %v217_v35 = vld [vmem:[%s1755_s6 + $0x8] sm:$0xff]  ;;  %1306 = vset.pattern.permute.xlu0 %v1401_v17  ;;  %1307 = vset.pattern.permute.xlu1 %v1401_v17 }
  0x15   :  { %v1321_v31 = vld [vmem:[%s1750_s1 + $0x30] sm:$0xff]   ;;  %v216_v34 = vld [vmem:[%s1755_s6] sm:$0xff]  ;;  %v219_v41 = vld [vmem:[%s1755_s6 + $0x18] sm:$0xff] }
  0x16   :  { %1126 = vmatpush3.bf16.msra.mxu1 %v1311_v21  ;;  %v1284_v39 = vpack.c.bf16 %v217_v35, %v216_v34  ;;  %v218_v40 = vld [vmem:[%s1755_s6 + $0x10] sm:$0xff]  ;;  %v220_v44 = vld [vmem:[%s1755_s6 + $0x20] sm:$0xff]  ;;  %v221_v45 = vld [vmem:[%s1755_s6 + $0x28] sm:$0xff] }
  0x17   :  { %1127 = vmatprep.subr.bf16.mxu1 %v1312_v22  ;;  %v1287_v43 = vpack.c.bf16 %v219_v41, %v218_v40  ;;  %v1290_v46 = vpack.c.bf16 %v221_v45, %v220_v44  ;;  %v1322_v47 = vld [vmem:[%s1750_s1 + $0x78] sm:$0xff]   ;;  %v222_v49 = vld [vmem:[%s1755_s6 + $0x30] sm:$0xff]  ;;  %v1327_v53 = vld [vmem:[%s1750_s1 + $0x140] sm:$0xff]  }
  0x18   :  { %v1323_v48 = vld [vmem:[%s1750_s1 + $0x38] sm:$0xff]   ;;  %v1328_v55 = vld [vmem:[%s1750_s1 + $0xc0] sm:$0xff]   ;;  %v1331_v57 = vld [vmem:[%s1750_s1 + $0x148] sm:$0xff]  }
  0x19   :  { %v223_v50 = vld [vmem:[%s1755_s6 + $0x38] sm:$0xff]  ;;  %v1329_v56 = vld [vmem:[%s1750_s1 + $0x100] sm:$0xff]   ;;  %v1333_v58 = vld [vmem:[%s1750_s1 + $0x108] sm:$0xff]  }
  0x1a   :  { %1128 = vmatpush3.bf16.msra.mxu1 %v1313_v23  ;;  %v1293_v51 = vpack.c.bf16 %v223_v50, %v222_v49  ;;  %v1326_v52 = vld [vmem:[%s1757_s8 + $0x4] ss:$24 sps:$4 sm:$0xff]   ;;  %v1324_v54 = vld [vmem:[%s1757_s8] ss:$24 sps:$4 sm:$0xff]   ;;  %v1335_v59 = vld [vmem:[%s1750_s1 + $0x150] sm:$0xff]  }
  0x1b   :  { %1129 = vmatprep.subr.bf16.mxu1 %v1314_v24  ;;  %819 = vmatprep.mubr.bf16.mxu1 %v1326_v52  ;;  %v1337_v60 = vld [vmem:[%s1750_s1 + $0x110] sm:$0xff]   ;;  %v1339_v61 = vld [vmem:[%s1750_s1 + $0x158] sm:$0xff]   ;;  %v1343_v63 = vld [vmem:[%s1750_s1 + $0x160] sm:$0xff]  }
  0x1c   :  { %v1341_v62 = vld [vmem:[%s1750_s1 + $0x118] sm:$0xff]   ;;  %v1345_v0 = vld [vmem:[%s1750_s1 + $0x120] sm:$0xff]   ;;  %v1347_v1 = vld [vmem:[%s1750_s1 + $0x168] sm:$0xff]  }
  0x1d   :  { %v1349_v3 = vld [vmem:[%s1750_s1 + $0x128] sm:$0xff]   ;;  %v1354_v7 = vld [vmem:[%s1750_s1 + $0x170] sm:$0xff]   ;;  %v1358_v9 = vld [vmem:[%s1750_s1 + $0x178] sm:$0xff]  }
  0x1e   :  { %1130 = vmatpush3.bf16.msra.mxu1 %v1315_v25  ;;  %v1351_v5 = vld [vmem:[%s1757_s8 + $0x34] ss:$24 sps:$4 sm:$0xff]   ;;  %v1353_v6 = vld [vmem:[%s1757_s8 + $0x30] ss:$24 sps:$4 sm:$0xff]   ;;  %v1360_v10 = vld [vmem:[%s1750_s1 + $0x138] sm:$0xff]  }
  0x1f   :  { %1131 = vmatprep.subr.bf16.mxu1 %v1316_v26  ;;  %v1356_v8 = vld [vmem:[%s1750_s1 + $0x130] sm:$0xff]   ;;  %v1368_v13 = vld [vmem:[%s1757_s8 + $0x44] ss:$24 sps:$4 sm:$0xff]   ;;  %v1372_v14 = vld [vmem:[%s1757_s8 + $0x40] ss:$24 sps:$4 sm:$0xff]  }
  0x20   :  { %v1364_v11 = vld [vmem:[%s1757_s8 + $0x14] ss:$24 sps:$4 sm:$0xff]   ;;  %v1362_v12 = vld [vmem:[%s1757_s8 + $0x10] ss:$24 sps:$4 sm:$0xff]   ;;  %v415_v15 = vld [vmem:[%s1758_s9] sm:$0xff] }
  0x21   :  { %v417_v16 = vld [vmem:[%s1758_s9 + $0x10] sm:$0xff]  ;;  %421 = vperm.xlu0 %1306, %v415_v15   ;;  %v416_v18 = vld [vmem:[%s1758_s9 + $0x8] sm:$0xff]  ;;  %v418_v19 = vld [vmem:[%s1758_s9 + $0x18] sm:$0xff] }
  0x22   :  { %1132 = vmatpush3.bf16.msra.mxu1 %v1317_v27  ;;  %431 = vperm.xlu1 %1307, %v417_v16   ;;  %v1037_v20 = vld [vmem:[%s1754_s5] ss:$0 sm:$0xff]  ;;  %v1367_v26 = vld [vmem:[%s1757_s8 + $0xc] ss:$24 sps:$4 sm:$0xff]   ;;  %v1359_v40 = vld [vmem:[%s1750_s1 + $0xf8] sm:$0xff]  }
  0x23   :  { %1133 = vmatprep.subr.bf16.mxu1 %v1318_v28  ;;  %v1330_v25 = vld [vmem:[%s1750_s1 + $0x80] sm:$0xff]   ;;  %v1332_v27 = vld [vmem:[%s1750_s1 + $0xc8] sm:$0xff]   ;;  %v1361_v41 = vld [vmem:[%s1750_s1 + $0xb8] sm:$0xff]  }
  0x24   :  { %v1344_v34 = vld [vmem:[%s1750_s1 + $0xe0] sm:$0xff]   ;;  %v1373_v44 = vld [vmem:[%s1757_s8 + $0x38] ss:$24 sps:$4 sm:$0xff]  }
  0x25   :  { %426 = vperm.xlu0 %1306, %v416_v18   ;;  %v1346_v35 = vld [vmem:[%s1750_s1 + $0xa0] sm:$0xff]  }
  0x26   :  { %1134 = vmatpush3.bf16.msra.mxu1 %v1319_v29  ;;  %436 = vperm.xlu1 %1307, %v418_v19   ;;  %v1334_v29 = vld [vmem:[%s1750_s1 + $0x88] sm:$0xff]  }
  0x27   :  { %1135 = vmatprep.subr.bf16.mxu1 %v1320_v30  ;;  %v1336_v30 = vld [vmem:[%s1750_s1 + $0xd0] sm:$0xff]  }
  0x2a   :  { %1136 = vmatpush3.bf16.msra.mxu1 %v1321_v31  ;;  %v1338_v31 = vld [vmem:[%s1750_s1 + $0x90] sm:$0xff]  }
  0x2b   :  { %1137 = vmatprep.subr.bf16.mxu1 %v1322_v47 }
  0x2e   :  { %1138 = vmatpush3.bf16.msra.mxu1 %v1323_v48 }
  0x2f   :  { %1179 = vmatprep.subr.bf16.mxu1 %v1327_v53 }
  0x31   :  { %820 = vmatmul.mubr.bf16.vlgmr.msra.gmra.mrb[4].mxu1 %v1324_v54 }
  0x32   :  { %1180 = vmatpush3.bf16.msra.mxu1 %v1329_v56  ;;  %827 = vmatprep.mubr.bf16.mxu1 %v1351_v5 }
  0x33   :  { %1181 = vmatprep.subr.bf16.mxu1 %v1331_v57 }
  0x36   :  { %1182 = vmatpush3.bf16.msra.mxu1 %v1333_v58 }
  0x37   :  { %1183 = vmatprep.subr.bf16.mxu1 %v1335_v59 }
  0x39   :  { %828 = vmatmul.mubr.bf16.gmra.mrb[8].mxu1 %v1353_v6 }
  0x3a   :  { %1184 = vmatpush3.bf16.msra.mxu1 %v1337_v60  ;;  %917 = vmatprep.mubr.bf16.mxu1 %v1364_v11 }
  0x3b   :  { %1185 = vmatprep.subr.bf16.mxu1 %v1339_v61 }
  0x3e   :  { %1186 = vmatpush3.bf16.msra.mxu1 %v1341_v62 }
  0x3f   :  { %1187 = vmatprep.subr.bf16.mxu1 %v1343_v63 }
  0x42   :  { %1188 = vmatpush3.bf16.msra.mxu1 %v1345_v0 }
  0x43   :  { %1189 = vmatprep.subr.bf16.mxu1 %v1347_v1 }
  0x46   :  { %1190 = vmatpush3.bf16.msra.mxu1 %v1349_v3 }
  0x47   :  { %1191 = vmatprep.subr.bf16.mxu1 %v1354_v7 }
  0x4a   :  { %1192 = vmatpush3.bf16.msra.mxu1 %v1356_v8 }
  0x4b   :  { %1193 = vmatprep.subr.bf16.mxu1 %v1358_v9 }
  0x4e   :  { %1194 = vmatpush3.bf16.msra.mxu1 %v1360_v10 }
  0x51   :  { %918 = vmatmul.mubr.bf16.vlgmr.msra.gmra.mrb[12].mxu1 %v1362_v12 }
  0x52   :  { %925 = vmatprep.mubr.bf16.mxu1 %v1368_v13 }
  0x59   :  { %926 = vmatmul.mubr.bf16.gmra.mrb[16].mxu1 %v1372_v14 }
  0xa0   :  { %v422_v8 = vpop.permute.xlu0 %421 }
  0xa1   :  { %v432_v13 = vpop.permute.xlu1 %431 }
  0xa4   :  { %v427_v10 = vpop.permute.xlu0 %426 }
  0xda   :  { %v117_v33 = vpop.f32.mrb[0].mxu1 }
  0xdb   :  { %v118_v36 = vadd.f32 %v1035_v32, %v117_v33  ;;  %v1218_v37 = vpop.f32.mrb[1].mxu1  ;;  %v1340_v32 = vld [vmem:[%s1750_s1 + $0xd8] sm:$0xff]  }
  0xdc   :  { %v1342_v33 = vld [vmem:[%s1750_s1 + $0x98] sm:$0xff]   ;;  %v1350_v37 = vld [vmem:[%s1750_s1 + $0xa8] sm:$0xff]  }
  0xdd   :  { %vm121_vm2 = vcmp.ge.f32.partialorder %v118_v36, 0.0  ;;  %v122_v38 = vmul.f32 0.1, %v118_v36 }
  0xdf   :  { %v123_v42 = vsel %vm121_vm2, %v118_v36, %v122_v38  ;;  %v1348_v36 = vld [vmem:[%s1750_s1 + $0xe8] sm:$0xff]   ;;  %v1355_v38 = vld [vmem:[%s1750_s1 + $0xf0] sm:$0xff]  }
  0xe0   :  { %1236 = vmatmul.mubr.msk.f32.vlgmr.msra.gmra.mrb[0].mxu0 %vm139_vm3, %v123_v42  ;;  %v1365_v42 = vld [vmem:[%s1757_s8 + $0x8] ss:$24 sps:$4 sm:$0xff]  }
  0xe1   :  { %1285 = vmatpush3.bf16.msra.mxu0 %v1284_v39  ;;  %1254 = vmatprep.mubr.msk.f32.mxu0 %vm1399_vm0, %v1400_v4  ;;  %v1357_v39 = vld [vmem:[%s1750_s1 + $0xb0] sm:$0xff]  }
  0xe2   :  { %1286 = vmatprep.subr.bf16.mxu0 %v1398_v2 }
  0xe5   :  { %1288 = vmatpush3.bf16.msra.mxu0 %v1287_v43  ;;  %v1370_v43 = vld [vmem:[%s1757_s8 + $0x3c] ss:$24 sps:$4 sm:$0xff]  }
  0xe6   :  { %1289 = vmatprep.subr.bf16.mxu0 %v1398_v2 }
  0xe9   :  { %1291 = vmatpush3.bf16.msra.mxu0 %v1290_v46 }
  0xea   :  { %1292 = vmatprep.subr.bf16.mxu0 %v1398_v2 }
  0xed   :  { %1294 = vmatpush3.bf16.msra.mxu0 %v1293_v51 }
  0xee   :  { %1151 = vmatprep.subr.bf16.mxu0 %v1328_v55 }
 0x104   :  { %v1139_v45 = vpop.f32.mrb[4].mxu1 }
 0x105   :  { %v1140_v46 = vpop.f32.mrb[5].mxu1 }
 0x106   :  { %v1142_v47 = vpop.f32.mrb[6].mxu1  ;;  %v1141_v49 = vadd.f32 %v1140_v46, %v1139_v45 }
 0x107   :  { %v1143_v48 = vpop.f32.mrb[7].mxu1 }
 0x108   :  { %v1144_v50 = vadd.f32 %v1143_v48, %v1142_v47  ;;  %v822_v12 = vadd.f32 %v1141_v49, %v422_v8 }
 0x10a   :  { %v825_v17 = vadd.f32 %v1144_v50, %v427_v10 }
 0x10c   :  { %v1145_v51 = vpop.f32.mrb[8].mxu1 }
 0x10d   :  { %v1146_v52 = vpop.f32.mrb[9].mxu1 }
 0x10e   :  { %v1147_v53 = vadd.f32 %v1146_v52, %v1145_v51  ;;  %v1148_v54 = vpop.f32.mrb[10].mxu1 }
 0x10f   :  { %v1149_v55 = vpop.f32.mrb[11].mxu1 }
 0x110   :  { %v1150_v56 = vadd.f32 %v1149_v55, %v1148_v54 }
 0x124   :  { %v1195_v57 = vpop.f32.mrb[12].mxu1 }
 0x125   :  { %v1196_v58 = vpop.f32.mrb[13].mxu1 }
 0x126   :  { %v1197_v59 = vadd.f32 %v1196_v58, %v1195_v57  ;;  %v1198_v60 = vpop.f32.mrb[14].mxu1 }
 0x127   :  { %v1199_v61 = vpop.f32.mrb[15].mxu1 }
 0x128   :  { %v1200_v62 = vadd.f32 %v1199_v61, %v1198_v60 }
 0x12c   :  { %v1201_v63 = vpop.f32.mrb[16].mxu1 }
 0x1b3   :  { %v209_v21 = vpop.f32.mrb[0].mxu0 }
 0x1b4   :  { %v210_v22 = vadd.f32 %v1037_v20, %v209_v21  ;;  %v1237_v23 = vpop.f32.mrb[1].mxu0 }
 0x1b6   :  { %vm213_vm4 = vcmp.ge.f32.partialorder %v210_v22, 0.0  ;;  %v214_v24 = vmul.f32 0.1, %v210_v22 }
 0x1b8   :  { %v215_v28 = vsel %vm213_vm4, %v210_v22, %v214_v24  ;;  %v437_v22 = vpop.permute.xlu1 %436 }
 0x1b9   :  { %1255 = vmatmul.mubr.msk.f32.vlgmr.msra.gmra.mrb[2].mxu0 %vm139_vm3, %v215_v28 }
 0x1ba   :  { %1152 = vmatpush3.bf16.msra.mxu0 %v1330_v25  ;;  %868 = vmatprep.mubr.bf16.mxu0 %v1367_v26 }
 0x1bb   :  { %1153 = vmatprep.subr.bf16.mxu0 %v1332_v27  ;;  %v830_v27 = vadd.f32 %v1147_v53, %v432_v13 }
 0x1be   :  { %1154 = vmatpush3.bf16.msra.mxu0 %v1334_v29 }
 0x1bf   :  { %1155 = vmatprep.subr.bf16.mxu0 %v1336_v30 }
 0x1c2   :  { %1156 = vmatpush3.bf16.msra.mxu0 %v1338_v31  ;;  %v833_v31 = vadd.f32 %v1150_v56, %v437_v22 }
 0x1c3   :  { %1157 = vmatprep.subr.bf16.mxu0 %v1340_v32 }
 0x1c6   :  { %1158 = vmatpush3.bf16.msra.mxu0 %v1342_v33 }
 0x1c7   :  { %1159 = vmatprep.subr.bf16.mxu0 %v1344_v34 }
 0x1ca   :  { %1160 = vmatpush3.bf16.msra.mxu0 %v1346_v35 }
 0x1cb   :  { %1161 = vmatprep.subr.bf16.mxu0 %v1348_v36 }
 0x1ce   :  { %1162 = vmatpush3.bf16.msra.mxu0 %v1350_v37 }
 0x1cf   :  { %1163 = vmatprep.subr.bf16.mxu0 %v1355_v38  ;;  %v1039_v38 = vld [vmem:[%s1756_s7] ss:$0 sm:$0xff]  ;;  %s1402_s7 = smov [#allocation2]  }
 0x1d0   :  { %s1027_s30 = sshll.u32 %s1402_s7, 4  ;;  %s1028_s30 = int_to_ptr.vmem [resolvable:$true] %s1027_s30 }
 0x1d1   :  { %s1374_s11 = scalar_lea.vmem %s1028_s30, 32  ;;  %p1379_p1 = scmp.lt.s32.totalorder %s1028_s30, %s1028_s30 }
 0x1d2   :  { %1164 = vmatpush3.bf16.msra.mxu0 %v1357_v39  ;;  %p1375_p0 = scmp.ne.s32.totalorder %s1028_s30, %s1374_s11  ;;  %p1380_p2 = scmp.lt.s32.totalorder %s1374_s11, %s1374_s11 }
 0x1d3   :  { %1165 = vmatprep.subr.bf16.mxu0 %v1359_v40 }
 0x1d4   :  { %p1381_p3 = por %p1380_p2, %p1379_p1 }
 0x1d6   :  { %1166 = vmatpush3.bf16.msra.mxu0 %v1361_v41  ;;  %p1382_p4 = pnand %p1381_p3, %p1375_p0 }
 0x1d7   :  { %1295 = vmatprep.subr.bf16.mxu0 %v1398_v2 }
 0x1d9   :  { %869 = vmatmul.mubr.bf16.vlgmr.msra.gmra.mrb[4].mxu0 %v1365_v42 }
 0x1da   :  { %876 = vmatprep.mubr.bf16.mxu0 %v1370_v43 }
 0x1e1   :  { %877 = vmatmul.mubr.bf16.gmra.mrb[8].mxu0 %v1373_v44 }
 0x1e2   :  { %1265 = vmatprep.mubr.msk.f32.mxu0 %vm1399_vm0, %v1400_v4  ;;  %v1202_v4 = vpop.f32.mrb[17].mxu1 }
 0x1e3   :  { %v1204_v0 = vpop.f32.mrb[18].mxu1  ;;  %v1203_v1 = vadd.f32 %v1202_v4, %v1201_v63 }
 0x1e4   :  { %v1205_v3 = vpop.f32.mrb[19].mxu1 }
 0x1e5   :  { %v1206_v5 = vadd.f32 %v1205_v3, %v1204_v0 }
 0x28c   :  { %v300_v6 = vpop.f32.mrb[2].mxu0 }
 0x28d   :  { %v1256_v7 = vpop.f32.mrb[3].mxu0  ;;  %v301_v43 = vadd.f32 %v1039_v38, %v300_v6 }
 0x28f   :  { %v305_v47 = vmul.f32 0.1, %v301_v43  ;;  %vm304_vm9 = vcmp.ge.f32.partialorder %v301_v43, 0.0 }
 0x291   :  { %v306_v49 = vsel %vm304_vm9, %v301_v43, %v305_v47 }
 0x2ac   :  { %v1167_v9 = vpop.f32.mrb[4].mxu0 }
 0x2ad   :  { %v1168_v11 = vpop.f32.mrb[5].mxu0 }
 0x2ae   :  { %v1169_v14 = vadd.f32 %v1168_v11, %v1167_v9  ;;  %v1170_v15 = vpop.f32.mrb[6].mxu0 }
 0x2af   :  { %v1171_v16 = vpop.f32.mrb[7].mxu0 }
 0x2b0   :  { %v871_v18 = vadd.f32 %v1169_v14, %v822_v12  ;;  %v1172_v19 = vadd.f32 %v1171_v16, %v1170_v15 }
 0x2b2   :  { %v920_v20 = vadd.f32 %v1197_v59, %v871_v18  ;;  %v874_v21 = vadd.f32 %v1172_v19, %v825_v17 }
 0x2b4   :  { %v938_v23 = vmul.f32 0.1, %v920_v20  ;;  %v923_v24 = vadd.f32 %v1200_v62, %v874_v21  ;;  %v1173_v25 = vpop.f32.mrb[8].mxu0  ;;  %vm934_vm5 = vcmp.ge.f32.partialorder %v920_v20, 0.0 }
 0x2b5   :  { %v1174_v26 = vpop.f32.mrb[9].mxu0 }
 0x2b6   :  { %vm935_vm6 = vcmp.ge.f32.partialorder %v923_v24, 0.0  ;;  %v939_v28 = vmul.f32 0.1, %v923_v24  ;;  %v1175_v29 = vadd.f32 %v1174_v26, %v1173_v25  ;;  %v1176_v30 = vpop.f32.mrb[10].mxu0  ;;  %v942_v35 = vsel %vm934_vm5, %v920_v20, %v938_v23 }
 0x2b7   :  { %v1177_v32 = vpop.f32.mrb[11].mxu0 }
 0x2b8   :  { %v879_v33 = vadd.f32 %v1175_v29, %v830_v27  ;;  %v1178_v34 = vadd.f32 %v1177_v32, %v1176_v30  ;;  %v943_v36 = vsel %vm935_vm6, %v923_v24, %v939_v28 }
 0x2b9   :  { %v1296_v37 = vpack.c.bf16 %v943_v36, %v942_v35 }
 0x2ba   :  { %v928_v39 = vadd.f32 %v1203_v1, %v879_v33  ;;  %v882_v40 = vadd.f32 %v1178_v34, %v833_v31 }
 0x2bb   :  { %1297 = vmatpush3.bf16.msra.mxu0 %v1296_v37 }
 0x2bc   :  { %v940_v41 = vmul.f32 0.1, %v928_v39  ;;  %v931_v42 = vadd.f32 %v1206_v5, %v882_v40  ;;  %1298 = vmatprep.subr.bf16.mxu0 %v1398_v2  ;;  %vm936_vm7 = vcmp.ge.f32.partialorder %v928_v39, 0.0 }
 0x2be   :  { %vm937_vm8 = vcmp.ge.f32.partialorder %v931_v42, 0.0  ;;  %v941_v44 = vmul.f32 0.1, %v931_v42  ;;  %v944_v45 = vsel %vm936_vm7, %v928_v39, %v940_v41 }
 0x2c0   :  { %v945_v46 = vsel %vm937_vm8, %v931_v42, %v941_v44 }
 0x2c1   :  { %v1299_v48 = vpack.c.bf16 %v945_v46, %v944_v45 }
 0x2c3   :  { %1300 = vmatpush3.bf16.msra.mxu0 %v1299_v48 }
 0x2c6   :  { %1266 = vmatmul.mubr.msk.f32.vlgmr.msra.gmra.mrb[12].mxu0 %vm946_vm10, %v306_v49 }
 0x399   :  { %v1016_v50 = vpop.f32.mrb[12].mxu0 }
 0x39a   :  { %1020 = vst [vmem:[#allocation2] sm:$0x3] %v1016_v50  ;;  %v1267_v51 = vpop.f32.mrb[13].mxu0 }
 0x39b   :  { %1385 = shalt.err (!%p1382_p4)
}
 0x39c   :  { %s1386_s14 = scalar_lea.hbm %s1759_s10, 32 }
 0x39d   :  { %p1387_p5 = scmp.ne.s32.totalorder %s1759_s10, %s1386_s14  ;;  %p1390_p6 = scmp.lt.u32.totalorder %s1386_s14, %s1759_s10 }
 0x39f   :  { %p1392_p7 = pnand %p1390_p6, %p1387_p5 }
 0x3a1   :  { %1395 = shalt.err (!%p1392_p7)
}
 0x3a2   :  { %1030 = dma.vmem_to_hbm [thread:$0]  %s1028_s30, 32, %s1759_s10, [#allocation3]  }
 0x3a3   :  { %1396 = dma.done.wait [#allocation3], 32  }
 0x3a4   :  { %1397 = vsyncadd [#allocation3], 4294967264 }
 0x3a5   :  { %1034 = vsyncpa [#allocation3], 1 }

</bundles_post_ra>
